<compile_context>
chip_gen: v7x
topology: tpu7x:2x2x1
jax: 0.10.0
libtpu: 0.0.40
codegen_flags: <defaults>
</compile_context>

<pallas_src>
import functools

import jax
import jax.numpy as jnp
from jax import lax
from jax.experimental import pallas as pl
from jax.experimental.pallas import tpu as pltpu


def _round_up(x: int, m: int) -> int:
    return (x + m - 1) // m * m


def _mse_preem_kernel(p_ref, t_ref, o_ref, *, n_rows: int, chunk_rows: int):
    """Per batch-tile partial sum of (d[i-1] + 2*d[i] + d[i+1])**2, d = p - t.

    The global loss is sum(partials) / (16 * B * L) (filter scale folded out).
    """
    tb, L = p_ref.shape            # block: tb rows x full row length L
    rc = chunk_rows
    nchunks = tb // rc
    lp = _round_up(L, 128)         # lane-aligned working width
    lanes_aligned = (lp == L)
    ragged_rows = (n_rows % tb) != 0

    # Loop-invariant masks / constants (hoisted out of the chunk loop).
    if lanes_aligned:
        lane = lax.broadcasted_iota(jnp.int32, (1, lp), 1)
        not_first = lane > 0
        not_last = lane < (lp - 1)
    else:
        zpad = jnp.zeros((rc, lp - L), jnp.float32)
    if ragged_rows:
        row_iota = lax.broadcasted_iota(jnp.int32, (rc, 1), 0)
        tile_row0 = pl.program_id(0) * tb

    def chunk_contrib(c):
        r0 = pl.multiple_of(c * rc, rc)
        p = p_ref[pl.ds(r0, rc), :].astype(jnp.float32)
        t = t_ref[pl.ds(r0, rc), :].astype(jnp.float32)
        # Filter linearity: preem(p) - preem(t) == preem(p - t).
        d = p - t
        if ragged_rows:
            # Last tile overhangs the batch; zero the out-of-bounds rows
            # (their contents are unspecified, possibly NaN/Inf).
            d = jnp.where(tile_row0 + r0 + row_iota < n_rows, d, 0.0)
        if not lanes_aligned:
            # Zero-extend to a 128-multiple width inside VMEM (no HBM pad).
            # This also supplies the conv zero padding at the right edge.
            d = jnp.concatenate([d, zpad], axis=1)
        # 3-tap [1, 2, 1] filter; the 1/4 scale is folded into the epilogue.
        xl = pltpu.roll(d, 1, axis=1)        # d[i-1] (lane 0 wraps)
        xr = pltpu.roll(d, lp - 1, axis=1)   # d[i+1] (lane lp-1 wraps)
        if lanes_aligned:
            xl = jnp.where(not_first, xl, 0.0)
            xr = jnp.where(not_last, xr, 0.0)
        # else: xl's wrapped lane picked up a padded zero, and xr's wrapped
        # value lands in a padded lane that is masked out after the loop.
        s = xl + (d + d) + xr
        return s * s

    acc = chunk_contrib(0)
    if nchunks > 1:
        acc = lax.fori_loop(1, nchunks, lambda c, a: a + chunk_contrib(c), acc,
                            unroll=min(nchunks - 1, 8))

    if not lanes_aligned:
        lane = lax.broadcasted_iota(jnp.int32, (1, lp), 1)
        acc = jnp.where(lane < L, acc, 0.0)   # drop padded-lane junk once

    # Fold (rc, lp) -> (8, 128): balanced tree over lane groups, then
    # sublane-aligned halving — only aligned slices + VPU adds.
    groups = [acc[:, g * 128:(g + 1) * 128] for g in range(lp // 128)]
    while len(groups) > 1:
        nxt = [groups[i] + groups[i + 1] for i in range(0, len(groups) - 1, 2)]
        if len(groups) % 2:
            nxt.append(groups[-1])
        groups = nxt
    folded = groups[0]
    r = rc
    while r > 8:
        r //= 2
        folded = folded[:r, :] + folded[r:, :]

    o_ref[0] = folded


def my_mse(predictions, targets, loss_type: int = 0):
    """Pallas implementation of myMSE.forward for 2-D inputs (B, L)."""
    if loss_type not in (0, 1, 2):
        raise ValueError(f"Invalid loss type {loss_type}.")
    # Types 0/1/2 all use the same [0.25, 0.5, 0.25] kernel in the reference.
    assert predictions.shape == targets.shape and predictions.ndim == 2
    B, L = predictions.shape

    itemsize = max(jnp.dtype(predictions.dtype).itemsize,
                   jnp.dtype(targets.dtype).itemsize)
    # Native sublane packing: f32 -> 8, bf16 -> 16, int8/fp8 -> 32 rows.
    rc = {4: 8, 2: 16, 1: 32}.get(itemsize, 8)

    # Tiny batches only: pad rows up to one packing group (negligible cost);
    # padded rows are zero in both inputs -> contribute exactly zero.
    if B < rc:
        predictions = jnp.pad(predictions, ((0, rc - B), (0, 0)))
        targets = jnp.pad(targets, ((0, rc - B), (0, 0)))
        Bp = rc
    else:
        Bp = B

    # Batch-tile size: big enough to amortize the ~0.35us per-grid-step cost,
    # small enough that 2 inputs x 2 pipeline buffers stay well inside scoped
    # VMEM on v5e/v6e/v7x (chunked accumulation keeps temporaries tiny), and
    # capped at ceil(B/2) so the parallel grid axis feeds both v7x TCs.
    in_budget = 10 * 1024 * 1024                 # 2 inputs x 2 pipeline buffers
    tb_mem = in_budget // (4 * L * itemsize)
    tb_cap = 1024                                # HBM roofline hit well before this
    tb_balance = _round_up(-(-Bp // 2), rc)      # >= 2 tiles whenever possible
    tb = max(rc, min(tb_mem, tb_cap, tb_balance))
    tb = (tb // rc) * rc
    num_tiles = -(-Bp // tb)
    # TODO(synk): for very large L (whole rows no longer fit VMEM, ~1e5+) also
    # tile the L axis with a 1-column halo; not needed for typical shapes.

    kernel = functools.partial(_mse_preem_kernel, n_rows=Bp, chunk_rows=rc)
    partials = pl.pallas_call(
        kernel,
        out_shape=jax.ShapeDtypeStruct((num_tiles, 8, 128), jnp.float32),
        grid_spec=pltpu.PrefetchScalarGridSpec(
            num_scalar_prefetch=0,
            grid=(num_tiles,),
            in_specs=[
                pl.BlockSpec((tb, L), lambda i: (i, 0)),
                pl.BlockSpec((tb, L), lambda i: (i, 0)),
            ],
            out_specs=pl.BlockSpec((1, 8, 128), lambda i: (i, 0, 0)),
        ),
        compiler_params=pltpu.CompilerParams(
            dimension_semantics=("parallel",),
            vmem_limit_bytes=32 * 1024 * 1024,
        ),
    )(predictions, targets)

    # Tiny epilogue: one reduce over num_tiles*8*128 lane-dense partials.
    # The 1/16 filter scale ([1,2,1]/4 squared) is folded in here.
    return jnp.sum(partials) * (1.0 / (16.0 * B * L))


def _reference(predictions, targets):
    """Pure-JAX reference mirroring the PyTorch module (for verification)."""
    def preem(x):
        xl = jnp.pad(x, ((0, 0), (1, 0)))[:, :-1]
        xr = jnp.pad(x, ((0, 0), (0, 1)))[:, 1:]
        return 0.25 * xl + 0.5 * x + 0.25 * xr
    p = predictions.astype(jnp.float32)
    t = targets.astype(jnp.float32)
    d = preem(p) - preem(t)
    return jnp.mean(d * d)


if __name__ == "__main__":
    # Primary small test (f32, aligned L, single-chunk tiles).
    key = jax.random.PRNGKey(0)
    kp, kt = jax.random.split(key)
    B, L = 16, 256
    predictions = jax.random.normal(kp, (B, L), dtype=jnp.float32)
    targets = jax.random.normal(kt, (B, L), dtype=jnp.float32)

    loss = my_mse(predictions, targets, loss_type=0)
    jax.block_until_ready(loss)
    ref = _reference(predictions, targets)
    assert jnp.allclose(loss, ref, rtol=1e-5, atol=1e-6), (loss, ref)

    # Secondary check: bf16 inputs, ragged last batch tile, multi-chunk loop.
    k1, k2 = jax.random.split(jax.random.PRNGKey(1))
    B2, L2 = 200, 512
    p2 = jax.random.normal(k1, (B2, L2), dtype=jnp.bfloat16)
    t2 = jax.random.normal(k2, (B2, L2), dtype=jnp.bfloat16)
    loss2 = my_mse(p2, t2, loss_type=1)
    jax.block_until_ready(loss2)
    ref2 = _reference(p2, t2)
    assert jnp.allclose(loss2, ref2, rtol=1e-4, atol=1e-6), (loss2, ref2)

    print("KERNEL_OK")
</pallas_src>

<mosaic_0001>
module attributes {stable_mosaic.version = 11 : i64} {
  func.func @_mse_preem_kernel(%arg0: i32, %arg1: memref<8x256xf32, #tpu.memory_space<vmem>>, %arg2: memref<8x256xf32, #tpu.memory_space<vmem>>, %arg3: memref<1x8x128xf32, #tpu.memory_space<vmem>>) attributes {dimension_semantics = [#tpu.dimension_semantics<parallel>], iteration_bounds = array<i64: 2>, scalar_prefetch = 0 : i64, scratch_operands = 0 : i64, tpu.core_type = #tpu.core_type<tc>, window_params = [{transform_indices = @transform_0, window_bounds = array<i64: 8, 256>}, {transform_indices = @transform_1, window_bounds = array<i64: 8, 256>}, {transform_indices = @transform_2, window_bounds = array<i64: 1, 8, 128>}]} {
    %0 = tpu.iota {dimensions = array<i32: 1>} : vector<1x256xi32>
    %c0_i32 = arith.constant 0 : i32
    %1 = vector.broadcast %c0_i32 : i32 to vector<1x256xi32>
    %2 = arith.cmpi sgt, %0, %1 : vector<1x256xi32>
    %c255_i32 = arith.constant 255 : i32
    %3 = vector.broadcast %c255_i32 : i32 to vector<1x256xi32>
    %4 = arith.cmpi slt, %0, %3 : vector<1x256xi32>
    %c0_i32_0 = arith.constant 0 : i32
    %5 = tpu.assume_multiple %c0_i32_0, 8 : i32
    %6 = arith.index_cast %5 : i32 to index
    %c0 = arith.constant 0 : index
    %7 = vector.load %arg1[%6, %c0] : memref<8x256xf32, #tpu.memory_space<vmem>>, vector<8x256xf32>
    %8 = arith.index_cast %5 : i32 to index
    %c0_1 = arith.constant 0 : index
    %9 = vector.load %arg2[%8, %c0_1] : memref<8x256xf32, #tpu.memory_space<vmem>>, vector<8x256xf32>
    %10 = arith.subf %7, %9 : vector<8x256xf32>
    %c1_i32 = arith.constant 1 : i32
    %11 = tpu.dynamic_rotate %10 by %c1_i32 dim 1 : vector<8x256xf32>, i32 -> vector<8x256xf32>
    %c255_i32_2 = arith.constant 255 : i32
    %12 = tpu.dynamic_rotate %10 by %c255_i32_2 dim 1 : vector<8x256xf32>, i32 -> vector<8x256xf32>
    %cst = arith.constant 0.000000e+00 : f32
    %13 = vector.shape_cast %2 : vector<1x256xi1> to vector<1x256xi1>
    %14 = vector.broadcast %13 : vector<1x256xi1> to vector<8x256xi1>
    %15 = vector.broadcast %cst : f32 to vector<8x256xf32>
    %16 = arith.select %14, %11, %15 : vector<8x256xi1>, vector<8x256xf32>
    %cst_3 = arith.constant 0.000000e+00 : f32
    %17 = vector.shape_cast %4 : vector<1x256xi1> to vector<1x256xi1>
    %18 = vector.broadcast %17 : vector<1x256xi1> to vector<8x256xi1>
    %19 = vector.broadcast %cst_3 : f32 to vector<8x256xf32>
    %20 = arith.select %18, %12, %19 : vector<8x256xi1>, vector<8x256xf32>
    %21 = arith.addf %10, %10 : vector<8x256xf32>
    %22 = arith.addf %16, %21 : vector<8x256xf32>
    %23 = arith.addf %22, %20 : vector<8x256xf32>
    %24 = arith.mulf %23, %23 : vector<8x256xf32>
    %25 = vector.extract_strided_slice %24 {offsets = [0, 0], sizes = [8, 128], strides = [1, 1]} : vector<8x256xf32> to vector<8x128xf32>
    %26 = vector.extract_strided_slice %24 {offsets = [0, 128], sizes = [8, 128], strides = [1, 1]} : vector<8x256xf32> to vector<8x128xf32>
    %27 = arith.addf %25, %26 : vector<8x128xf32>
    %c0_4 = arith.constant 0 : index
    %c0_5 = arith.constant 0 : index
    %c0_6 = arith.constant 0 : index
    %28 = vector.load %arg3[%c0_4, %c0_5, %c0_6] : memref<1x8x128xf32, #tpu.memory_space<vmem>>, vector<1x8x128xf32>
    %29 = vector.shape_cast %28 : vector<1x8x128xf32> to vector<8x128xf32>
    %30 = vector.shape_cast %27 : vector<8x128xf32> to vector<1x8x128xf32>
    tpu.vector_store %arg3[%c0_4, %c0_5, %c0_6], %30 {strides = array<i32>} : memref<1x8x128xf32, #tpu.memory_space<vmem>>, vector<1x8x128xf32>,
    return
  }
  func.func @transform_0(%arg0: i32) -> (i32, i32) {
    %c0_i32 = arith.constant 0 : i32
    %c0_i32_0 = arith.constant 0 : i32
    return %arg0, %c0_i32 : i32, i32
  }
  func.func @transform_1(%arg0: i32) -> (i32, i32) {
    %c0_i32 = arith.constant 0 : i32
    %c0_i32_0 = arith.constant 0 : i32
    return %arg0, %c0_i32 : i32, i32
  }
  func.func @transform_2(%arg0: i32) -> (i32, i32, i32) {
    %c0_i32 = arith.constant 0 : i32
    %c0_i32_0 = arith.constant 0 : i32
    %c0_i32_1 = arith.constant 0 : i32
    return %arg0, %c0_i32, %c0_i32_0 : i32, i32, i32
  }
}

</mosaic_0001>

<bundles_post_ra>
// kernel: tpu_custom_call.1
= control target key start
LH: loop header
LB: loop body
LE: loop exit
PB: predicated region body
PF: predicated region fallthrough
CT: control target
= control target key end

     0   :  { %7 = vsyncpa [#allocation3], 0  ;;  %s795_s0 = inlined_call_operand.hbm [shape: f32[16,256], index: 0, kind: input, shape index: {}]   ;;  %s796_s1 = inlined_call_operand.hbm [shape: f32[16,256], index: 1, kind: input, shape index: {}]   ;;  %s797_s2 = inlined_call_operand.hbm [shape: f32[2,8,128], index: 2, kind: output, shape index: {}]  }
   0x1   :  { %9 = vsyncpa [#allocation3 + $0x1], 0 }
   0x2   :  { %10 = vsyncpa [#allocation6], 0 }
   0x3   :  { %12 = vsyncpa [#allocation6 + $0x1], 0 }
   0x4   :  { %13 = vsyncpa [#allocation4], 0 }
   0x5   :  { %15 = vsyncpa [#allocation4 + $0x1], 0  ;;  %s583_s9 = smov 0   ;;  %s585_s10 = smov 0  }
   0x6   :  { %s587_s11 = smov 0   ;;  %s589_s12 = smov 0  }
   0x7 LB: > { %s604_s13 = sadd.s32 4294967295, %s561_s12   ;;  %s359_s14 = sadd.s32 4294967294, %s561_s12   ;;  %s561_s12 = sphi %s589_s12, %s816_s12   ;;  %s557_s11 = sphi %s587_s11, %s815_s11   ;;  %s553_s10 = sphi %s585_s10, %s814_s10   ;;  %s549_s9 = sphi %s583_s9, %s813_s9  }
   0x8   : > { %s608_s15 = sadd.s32 1, %s561_s12   ;;  %s28_s16 = sadd.s32 1, %s557_s11 }
   0x9   : > { %s25_s17 = ssub.s32 %s561_s12, %s608_s15  ;;  %p35_p0 = scmp.ne.s32.totalorder %s557_s11, %s553_s10 }
   0xa   : > { %p26_p1 = scmp.eq.s32.totalorder %s25_s17, 0  ;;  %p36_p2 = scmp.eq.s32.totalorder %s561_s12, 0 }
   0xb   : > { %p41_p3 = scmp.ne.s32.totalorder %s553_s10, %s549_s9  ;;  %p42_p4 = scmp.eq.s32.totalorder %s604_s13, 0 }
   0xc   : > { %s620_s18 = scalar_select %p26_p1, %s557_s11, %s28_s16  }
   0xd   : > { %p622_p5 = por %p36_p2, %p35_p0  ;;  %p626_p6 = por %p42_p4, %p41_p3 }
   0xe   : > { %p91_p7 = scmp.eq.s32.totalorder %s604_s13, 1  ;;  %p97_p8 = scmp.eq.s32.totalorder %s359_s14, 1 }
   0xf   : > { %s801_s20 = scalar_select %p626_p6, 1, 0 }
  0x10   : > { %p395_p10 = scmp.lt.s32.totalorder %s561_s12, 2  ;;  %p633_p11 = por %p91_p7, %p35_p0 }
  0x11   : > { %p637_p12 = por %p97_p8, %p41_p3  ;;  %s642_s23 = sand.u32 1, %s557_s11  }
  0x12   : > { %s802_s21 = scalar_select %p633_p11, 1, 0 }
  0x13   : > { %s803_s22 = scalar_select %p637_p12, 1, 0 }
  0x14   : > { %s376_s24 = sshll.u32 %s561_s12, 8  ;;  %s362_s25 = sshll.u32 %s642_s23, 4 }
  0x15   : > { %s651_s28 = scalar_lea.hbm %s795_s0, %s376_s24  ;;  %s121_s29 = scalar_lea.vmem [#allocation2], %s362_s25 }
  0x16   : > { %s129_s30 = sshll.u32 %s121_s29, 4  ;;  %p657_p13 = pnand %p395_p10, %p622_p5  ;;  %s661_s30 = int_to_ptr.vmem [resolvable:$true] %s129_s30 }
  0x17   : > { %s118_s4 = scalar_lea.sflag [#allocation3], %s642_s23  ;;  %s431_s5 = scalar_lea.hbm %s651_s28, 256 }
  0x18   : > { %p432_p2 = scmp.ne.s32.totalorder %s651_s28, %s431_s5  ;;  %p433_p3 = pneg %p657_p13 }
  0x19   : > { %s436_s8 = scalar_lea.hbm %s795_s0, 512  ;;  %p437_p5 = scmp.lt.u32.totalorder %s651_s28, %s795_s0 }
  0x1a   : > { %p434_p4 = pnand %p433_p3, %p432_p2  ;;  %p438_p8 = scmp.lt.u32.totalorder %s436_s8, %s431_s5 }
  0x1b   : > { %p440_p9 = scmp.lt.u32.totalorder %s431_s5, %s651_s28 }
  0x1c   : > { %p435_p7 = pneg %p434_p4  ;;  %p439_p10 = por %p438_p8, %p437_p5 }
  0x1e   : > { %p441_p0 = por %p440_p9, %p439_p10 }
  0x20   : > { %p442_p1 = pnand %p441_p0, %p435_p7 }
  0x22   : > { %445 = shalt.err (!%p442_p1)
}
  0x23   : > { %s446_s17 = scalar_lea.vmem %s661_s30, 256  ;;  %s563_s19 = smov [#allocation2]  }
  0x24   : > { %p447_p2 = scmp.ne.s32.totalorder %s661_s30, %s446_s17  ;;  %s451_s26 = sshll.u32 %s563_s19, 4  ;;  %s452_s26 = int_to_ptr.vmem [resolvable:$false] %s451_s26 }
  0x25   : > { %s453_s27 = scalar_lea.vmem %s452_s26, 512  ;;  %p454_p11 = scmp.lt.s32.totalorder %s661_s30, %s452_s26 }
  0x26   : > { %p449_p4 = pnand %p447_p2, %p433_p3  ;;  %p455_p5 = scmp.lt.s32.totalorder %s453_s27, %s446_s17 }
  0x28   : > { %p450_p12 = pneg %p449_p4  ;;  %p456_p8 = por %p455_p5, %p454_p11 }
  0x2a   : > { %p457_p9 = pnand %p456_p8, %p450_p12 }
  0x2c   : > { %460 = shalt.err (!%p457_p9)
}
  0x2d   : > { %387 = dma.hbm_to_vmem [thread:$0]  (!%p657_p13), %s651_s28, 256, %s661_s30, %s118_s4  }
  0x2e   : > { %p805_p0 = scmp.lt.s32.totalorder %s561_s12, 3  ;;  %p806_p1 = scmp.ge.s32.totalorder %s561_s12, 1 }
  0x2f   : > { %s704_s7 = scalar_lea.hbm %s796_s1, %s376_s24  ;;  %s140_s8 = scalar_lea.vmem [#allocation5], %s362_s25 }
  0x30   : > { %p695_p7 = pnand %p806_p1, %p805_p0  ;;  %s148_s14 = sshll.u32 %s140_s8, 4  ;;  %s149_s14 = int_to_ptr.vmem [resolvable:$true] %s148_s14 }
  0x31   : > { %s137_s28 = scalar_lea.sflag [#allocation6], %s642_s23  ;;  %s461_s30 = scalar_lea.hbm %s704_s7, 256 }
  0x32   : > { %s807_s29 = scalar_select %p695_p7, 1, 0 }
  0x33   : > { %p462_p11 = scmp.ne.s32.totalorder %s704_s7, %s461_s30  ;;  %s466_s24 = scalar_lea.hbm %s796_s1, 512 }
  0x34   : > { %p467_p2 = scmp.lt.u32.totalorder %s704_s7, %s796_s1  ;;  %p468_p4 = scmp.lt.u32.totalorder %s466_s24, %s461_s30 }
  0x35   : > { %p464_p12 = pnand %p462_p11, %p433_p3  ;;  %p470_p8 = scmp.lt.u32.totalorder %s461_s30, %s704_s7 }
  0x36   : > { %p469_p5 = por %p468_p4, %p467_p2 }
  0x37   : > { %p465_p10 = pneg %p464_p12 }
  0x38   : > { %p471_p9 = por %p470_p8, %p469_p5 }
  0x3a   : > { %p472_p0 = pnand %p471_p9, %p465_p10 }
  0x3c   : > { %475 = shalt.err (!%p472_p0)
}
  0x3d   : > { %s476_s23 = scalar_lea.vmem %s149_s14, 256  ;;  %s564_s25 = smov [#allocation5]  }
  0x3e   : > { %p477_p1 = scmp.ne.s32.totalorder %s149_s14, %s476_s23  ;;  %s481_s26 = sshll.u32 %s564_s25, 4  ;;  %s482_s26 = int_to_ptr.vmem [resolvable:$false] %s481_s26 }
  0x3f   : > { %s483_s27 = scalar_lea.vmem %s482_s26, 512  ;;  %p484_p6 = scmp.lt.s32.totalorder %s149_s14, %s482_s26 }
  0x40   : > { %p479_p11 = pnand %p477_p1, %p433_p3  ;;  %p485_p7 = scmp.lt.s32.totalorder %s483_s27, %s476_s23 }
  0x42   : > { %p480_p12 = pneg %p479_p11  ;;  %p486_p2 = por %p485_p7, %p484_p6 }
  0x44   : > { %p487_p4 = pnand %p486_p2, %p480_p12 }
  0x46   : > { %490 = shalt.err (!%p487_p4)
}
  0x47   : > { %390 = dma.hbm_to_vmem [thread:$0]  (!%p657_p13), %s704_s7, 256, %s149_s14, %s137_s28  }
  0x48   : > { %p808_p10 = scmp.ne.s32.totalorder %s807_s29, 0 }
  0x49   : > { %s731_s5 = sand.u32 (!%p808_p10), 1, %s553_s10   ;;  %p809_p3 = scmp.ne.s32.totalorder (!%p808_p10), %s801_s20, 0 }
  0x4a   : > { %157 = sbr.rel (%p808_p10) target bundleno = 231 (0xe7), region = 28  ;;  %s369_s6 = sshll.u32 (!%p808_p10), %s731_s5, 4 }
  0x4b   : > { %s160_s8 = scalar_lea.sflag (!%p808_p10), [#allocation3], %s731_s5  ;;  %s163_s30 = scalar_lea.vmem (!%p808_p10), [#allocation2], %s369_s6 }
  0x51   : > { %536 = dma.done.wait (%p809_p3), %s160_s8, 256  }
  0x52   : > { %538 = vsyncadd (%p809_p3), %s160_s8, 4294967040  ;;  %s169_s3 = scalar_lea.sflag [#allocation6], %s731_s5  ;;  %s172_s7 = scalar_lea.vmem [#allocation5], %s369_s6 }
  0x53   : > { %540 = dma.done.wait (%p809_p3), %s169_s3, 256  }
  0x54   : > { %542 = vsyncadd (%p809_p3), %s169_s3, 4294967040  ;;  %v208_v0 = vld [vmem:[%s163_s30] sm:$0xff]  ;;  %v209_v2 = vld [vmem:[%s163_s30 + $0x8] sm:$0xff]  ;;  %s565_s29 = smov 127   ;;  %s566_s14 = smov 1   ;;  %v198_v6 = vlaneseq }
  0x55   : > { %v212_v1 = vld [vmem:[%s172_s7] sm:$0xff]  ;;  %v213_v4 = vld [vmem:[%s172_s7 + $0x8] sm:$0xff]  ;;  %s371_s20 = sshll.u32 %s731_s5, 3  ;;  %s373_s28 = sshll.u32 %s604_s13, 7 }
  0x56   : > { %v214_v3 = vsub.f32 %v208_v0, %v212_v1  ;;  %v215_v5 = vsub.f32 %v209_v2, %v213_v4  ;;  %v199_v7 = vand.u32 127, %v198_v6  ;;  %s197_s4 = scalar_lea.vmem [#allocation7], %s371_s20  ;;  %s751_s19 = scalar_lea.hbm %s797_s2, %s373_s28 }
  0x57   : > { %s266_s16 = sshll.u32 %s197_s4, 4  ;;  %s253_s23 = scalar_lea.sflag [#allocation4], %s731_s5  ;;  %s753_s16 = int_to_ptr.vmem [resolvable:$true] %s266_s16 }
  0x58   : > { %223 = vrot.lane.b32.xlu1 %v214_v3, %s565_s29  ;;  %216 = vrot.lane.b32.xlu0 %v214_v3, %s566_s14  ;;  %v200_v8 = vadd.s32 128, %v199_v7  ;;  %vm227_vm0 = vcmp.lt.s32.totalorder %v199_v7, 127  ;;  %vm220_vm1 = vcmp.lt.s32.totalorder %v199_v7, 1  ;;  %v243_v11 = vadd.f32 %v215_v5, %v215_v5  ;;  %s491_s25 = scalar_lea.vmem %s753_s16, 128  ;;  %p810_p13 = scmp.ne.s32.totalorder %s802_s21, 0 }
  0x59   : > { %vm201_vm3 = vcmp.gt.s32.totalorder %v199_v7, 0  ;;  %v242_v12 = vadd.f32 %v214_v3, %v214_v3  ;;  %p492_p6 = scmp.ne.s32.totalorder %s753_s16, %s491_s25  ;;  %s567_s13 = smov [#allocation7]  }
  0x5a   : > { %vm204_vm2 = vcmp.lt.s32.totalorder %v200_v8, 255  ;;  %s495_s26 = sshll.u32 %s567_s13, 4  ;;  %s496_s26 = int_to_ptr.vmem [resolvable:$false] %s495_s26 }
  0x5b   : > { %p493_p7 = pnand %p492_p6, %p810_p13  ;;  %s497_s27 = scalar_lea.vmem %s496_s26, 256 }
  0x5c   : > { %225 = vrot.lane.b32.xlu1 %v215_v5, %s565_s29  ;;  %218 = vrot.lane.b32.xlu0 %v215_v5, %s566_s14  ;;  %p498_p8 = scmp.lt.s32.totalorder %s753_s16, %s496_s26  ;;  %p499_p9 = scmp.lt.s32.totalorder %s497_s27, %s491_s25 }
  0x5d   : > { %p494_p5 = pneg %p493_p7 }
  0x5e   : > { %p500_p0 = por %p499_p9, %p498_p8 }
  0x60   : > { %p501_p1 = pnand %p500_p0, %p494_p5 }
  0xca   : > { %v224_v9 = vpop.permute.xlu1 %223  ;;  %v217_v10 = vpop.permute.xlu0 %216 }
  0xce   : > { %v226_v13 = vpop.permute.xlu1 %225  ;;  %v219_v14 = vpop.permute.xlu0 %218 }
  0xcf   : > { %v229_v15 = vsel %vm227_vm0, %v226_v13, %v224_v9  ;;  %v221_v16 = vsel %vm220_vm1, %v217_v10, %v219_v14  ;;  %v222_v17 = vsel %vm220_vm1, %v219_v14, %v217_v10  ;;  %v228_v22 = vsel %vm227_vm0, %v224_v9, %v226_v13 }
  0xd0   : > { %v241_v18 = vsel %vm204_vm2, %v229_v15, 0.0  ;;  %v234_v19 = vsel %vm201_vm3, %v222_v17, 0.0  ;;  %v245_v20 = vadd.f32 %v243_v11, %v221_v16 }
  0xd1   : > { %v244_v21 = vadd.f32 %v242_v12, %v234_v19 }
  0xd2   : > { %v247_v23 = vadd.f32 %v245_v20, %v241_v18 }
  0xd3   : > { %v246_v24 = vadd.f32 %v244_v21, %v228_v22 }
  0xd4   : > { %v249_v25 = vmul.f32 %v247_v23, %v247_v23 }
  0xd5   : > { %v248_v26 = vmul.f32 %v246_v24, %v246_v24 }
  0xd7   : > { %v250_v27 = vadd.f32 %v249_v25, %v248_v26 }
  0xd9   : > { %251 = vst [vmem:[%s197_s4] sm:$0xff] %v250_v27 }
  0xda   : > { %504 = shalt.err (!%p501_p1)
}
  0xdb   : > { %s505_s5 = scalar_lea.hbm %s751_s19, 128  ;;  %s509_s30 = scalar_lea.hbm %s797_s2, 256 }
  0xdc   : > { %p506_p11 = scmp.ne.s32.totalorder %s751_s19, %s505_s5  ;;  %p510_p4 = scmp.lt.u32.totalorder %s751_s19, %s797_s2 }
  0xdd   : > { %p511_p10 = scmp.lt.u32.totalorder %s509_s30, %s505_s5  ;;  %p513_p6 = scmp.lt.u32.totalorder %s505_s5, %s751_s19 }
  0xde   : > { %p507_p12 = pnand %p506_p11, %p810_p13 }
  0xdf   : > { %p512_p3 = por %p511_p10, %p510_p4 }
  0xe0   : > { %p508_p2 = pneg %p507_p12 }
  0xe1   : > { %p514_p7 = por %p513_p6, %p512_p3 }
  0xe3   : > { %p515_p5 = pnand %p514_p7, %p508_p2 }
  0xe5   : > { %518 = shalt.err (!%p515_p5)
}
  0xe6   : > { %382 = dma.vmem_to_hbm [thread:$0]  (%p810_p13), %s753_s16, 128, %s751_s19, %s253_s23  }
  0xe7 PF: > { %s278_s29 = sand.u32 1, %s549_s9   ;;  %p811_p8 = scmp.ne.s32.totalorder %s803_s22, 0 }
  0xe8   : > { %p812_p9 = scmp.ge.s32.totalorder %s561_s12, 2  ;;  %s279_s14 = scalar_lea.sflag [#allocation4], %s278_s29 }
  0xea   : > { %p392_p0 = pnand %p812_p9, %p811_p8 }
  0xec   : > { %544 = dma.done.wait (!%p392_p0), %s279_s14, 128  }
  0xed   : > { %546 = vsyncadd (!%p392_p0), %s279_s14, 4294967168  ;;  %p18_p1 = scmp.ge.s32.totalorder %s608_s15, 4   ;;  %s813_s9 = smov %s553_s10 }
  0xee   : > { %s814_s10 = smov %s557_s11  ;;  %s815_s11 = smov %s620_s18 }
  0xef   : > { %s816_s12 = smov %s608_s15  ;;  %20 = sbr.rel (!%p18_p1) target bundleno = 7 (0x7), region = 88 }
  0xf6   :  { %284 = vsyncpa [#allocation3], 1 }
  0xf7   :  { %286 = vsyncpa [#allocation3 + $0x1], 1 }
  0xf8   :  { %287 = vsyncpa [#allocation6], 1 }
  0xf9   :  { %289 = vsyncpa [#allocation6 + $0x1], 1 }
  0xfa   :  { %290 = vsyncpa [#allocation4], 1 }
  0xfb   :  { %292 = vsyncpa [#allocation4 + $0x1], 1 }

</bundles_post_ra>
